<compile_context>
chip_gen: v6e
topology: v6e:2x2x1
jax: 0.10.0
libtpu: 0.0.40
codegen_flags: <defaults>
</compile_context>

<pallas_src>
import jax
import jax.numpy as jnp
from jax.experimental import pallas as pl
from jax.experimental.pallas import tpu as pltpu


# ----------------------------------------------------------------------------
# Fused kernel: [global_add_pool] -> (Linear + ReLU) x (L-1) -> Linear
# ----------------------------------------------------------------------------
def _make_fused_kernel(n_layers, pool):
    """Build the fused kernel body for a static layer count / pooling flag."""

    def kernel(*refs):
        refs = list(refs)
        if pool:
            bidx_ref = refs.pop(0)   # [1, N] int32: graph id of each node
        x_ref = refs.pop(0)          # [N, F_in] node-level or [G, F_in] graph-level
        o_ref = refs.pop()           # [G, F_out]
        # remaining refs: L affine slabs, each [din+1, dout] = [W ; b] with
        # eval-mode BatchNorms already folded in.

        h = x_ref[...].astype(jnp.float32)

        if pool:
            # global_add_pool as an in-register one-hot matmul on the MXU:
            #   onehot[g, n] = (batch_index[n] == g);  pooled = onehot @ x
            num_graphs = o_ref.shape[0]
            num_nodes = x_ref.shape[0]
            row_ids = jax.lax.broadcasted_iota(
                jnp.int32, (num_graphs, num_nodes), 0
            )
            onehot = (row_ids == bidx_ref[...]).astype(jnp.float32)
            h = jnp.dot(onehot, h, preferred_element_type=jnp.float32)

        for layer in range(n_layers):
            wb_ref = refs[layer]
            din = wb_ref.shape[0] - 1        # static
            wb = wb_ref[...]                 # single tiny VMEM load
            w = wb[:din, :]
            b = wb[din:, :]
            h = jnp.dot(h, w, preferred_element_type=jnp.float32) + b
            if layer < n_layers - 1:
                # BN already folded into (W, b); dropout is identity in eval.
                h = jnp.maximum(h, 0.0)
        # TODO(synk): training-mode dropout would use pltpu.prng_seed /
        # pltpu.prng_random_bits; omitted here (eval mode -> identity).

        o_ref[...] = h.astype(o_ref.dtype)

    return kernel


# ----------------------------------------------------------------------------
# Parameter init (PyTorch-like) + eval-mode BatchNorm folding + slab packing
# ----------------------------------------------------------------------------
def init_params(key, dim_ogct, dim_hid, dim_ct, n_layers, raw_bn=True):
    """Returns raw params (for the pure-JAX reference) and packed kernel params."""
    eps = 1e-5
    dims = [dim_ogct] + [dim_hid] * (n_layers - 1) + [dim_ct]

    linears, bns = [], []
    for i in range(n_layers):
        key, kw, kb = jax.random.split(key, 3)
        fan_in = dims[i]
        bound = 1.0 / float(fan_in) ** 0.5
        W = jax.random.uniform(kw, (dims[i], dims[i + 1]), jnp.float32, -bound, bound)
        b = jax.random.uniform(kb, (1, dims[i + 1]), jnp.float32, -bound, bound)
        linears.append((W, b))
        if i < n_layers - 1:
            key, kg, kbt = jax.random.split(key, 3)
            gamma = 1.0 + 0.1 * jax.random.normal(kg, (1, dims[i + 1]), jnp.float32)
            beta = 0.1 * jax.random.normal(kbt, (1, dims[i + 1]), jnp.float32)
            # eval-mode BN with running_mean=0, running_var=1
            bns.append((gamma / jnp.sqrt(1.0 + eps), beta))

    raw = None
    if raw_bn:
        key, kg, kbt = jax.random.split(key, 3)
        gamma = 1.0 + 0.1 * jax.random.normal(kg, (1, dim_ogct), jnp.float32)
        beta = 0.1 * jax.random.normal(kbt, (1, dim_ogct), jnp.float32)
        raw = (gamma / jnp.sqrt(1.0 + eps), beta)

    # ---- fold eval-mode BNs into the Linear layers (zero runtime cost) ----
    folded = []
    for i, (W, b) in enumerate(linears):
        if i == 0 and raw is not None:
            # (x*s + t) @ W + b  ==  x @ (s^T * W) + (t @ W + b)
            s, t = raw
            W = W * s.reshape(-1, 1)
            b = t @ linears[0][0] + b
        if i < n_layers - 1:
            # (x @ W + b)*s + t  ==  x @ (W*s) + (b*s + t)
            s, t = bns[i]
            W = W * s
            b = b * s + t
        folded.append((W, b))

    # ---- pack each (W, b) into one [din+1, dout] slab (fewer kernel operands)
    fused = [jnp.concatenate([W, b], axis=0) for (W, b) in folded]

    return {"linears": linears, "bns": bns, "raw_bn": raw, "fused": fused}


# ----------------------------------------------------------------------------
# Forward pass: one pallas_call for the whole module
# ----------------------------------------------------------------------------
def mlp_graph_count_encoder_forward(graph_hom, batch_index, num_graphs, params,
                                    *, pool):
    """pool=True: graph_hom is node-level -> global_add_pool inside the kernel.
    (Explicit flag instead of the fragile n_rows == num_graphs heuristic.)"""
    fused = params["fused"]
    out_dim = fused[-1].shape[1]

    args = []
    if pool:
        args.append(batch_index.reshape(1, -1).astype(jnp.int32))
    args.append(graph_hom)
    args.extend(fused)

    kernel = _make_fused_kernel(len(fused), pool)
    return pl.pallas_call(
        kernel,
        out_shape=jax.ShapeDtypeStruct((num_graphs, out_dim), jnp.float32),
        in_specs=[pl.BlockSpec(memory_space=pltpu.MemorySpace.VMEM)
                  for _ in args],
        out_specs=pl.BlockSpec(memory_space=pltpu.MemorySpace.VMEM),
    )(*args)
    # TODO(synk): at realistic graph sizes (N in the thousands) the pooling
    # would need a grid over the node axis ("arbitrary" reduction) with tiles
    # sized from pltpu.get_tpu_info().vmem_capacity_bytes so one code path
    # fits both 128 MiB (v5e/v6e) and 64 MiB (v7x) VMEM; unnecessary here.


# ----------------------------------------------------------------------------
# Pure-JAX reference (unfolded params) for a sanity check
# ----------------------------------------------------------------------------
def _reference_forward(graph_hom, batch_index, num_graphs, params, *, pool):
    h = graph_hom.astype(jnp.float32)
    if pool:
        onehot = (jnp.arange(num_graphs)[:, None] == batch_index[None, :]
                  ).astype(jnp.float32)
        h = onehot @ h
    if params["raw_bn"] is not None:
        s, t = params["raw_bn"]
        h = h * s + t
    n_layers = len(params["linears"])
    for i, (W, b) in enumerate(params["linears"]):
        h = h @ W + b
        if i < n_layers - 1:
            s, t = params["bns"][i]
            h = h * s + t
            h = jnp.maximum(h, 0.0)
    return h


if __name__ == "__main__":
    # cfg.ctenc_GraphCountEnc (synthetic, small):
    dim_ogct, dim_hid, dim_ct, n_layers = 8, 32, 16, 3
    num_nodes, num_graphs = 16, 4

    key = jax.random.PRNGKey(0)
    k1, k2, k3 = jax.random.split(key, 3)

    # node-level homomorphism counts -> pooling path is exercised
    graph_hom = jax.random.normal(k1, (num_nodes, dim_ogct), jnp.float32)
    batch_index = jnp.sort(
        jax.random.randint(k2, (num_nodes,), 0, num_graphs, dtype=jnp.int32)
    )
    params = init_params(k3, dim_ogct, dim_hid, dim_ct, n_layers, raw_bn=True)

    out = mlp_graph_count_encoder_forward(
        graph_hom, batch_index, num_graphs, params, pool=True
    )
    out = jax.block_until_ready(out)

    assert out.shape == (num_graphs, dim_ct), out.shape
    assert out.dtype == jnp.float32

    ref = _reference_forward(
        graph_hom, batch_index, num_graphs, params, pool=True
    )
    assert jnp.allclose(out, ref, rtol=1e-4, atol=1e-4), (
        float(jnp.max(jnp.abs(out - ref)))
    )
    print("KERNEL_OK")
</pallas_src>

<mosaic_0001>
module attributes {stable_mosaic.version = 11 : i64} {
  func.func @kernel(%arg0: memref<1x16xi32, #tpu.memory_space<vmem>>, %arg1: memref<16x8xf32, #tpu.memory_space<vmem>>, %arg2: memref<9x32xf32, #tpu.memory_space<vmem>>, %arg3: memref<33x32xf32, #tpu.memory_space<vmem>>, %arg4: memref<33x16xf32, #tpu.memory_space<vmem>>, %arg5: memref<4x16xf32, #tpu.memory_space<vmem>>) attributes {dimension_semantics = [], scalar_prefetch = 0 : i64, scratch_operands = 0 : i64, tpu.core_type = #tpu.core_type<tc>} {
    %c0 = arith.constant 0 : index
    %c0_0 = arith.constant 0 : index
    %0 = vector.load %arg1[%c0, %c0_0] : memref<16x8xf32, #tpu.memory_space<vmem>>, vector<16x8xf32>
    %1 = tpu.iota {dimensions = array<i32: 0>} : vector<4x16xi32>
    %c0_1 = arith.constant 0 : index
    %c0_2 = arith.constant 0 : index
    %2 = vector.load %arg0[%c0_1, %c0_2] : memref<1x16xi32, #tpu.memory_space<vmem>>, vector<1x16xi32>
    %3 = vector.broadcast %2 : vector<1x16xi32> to vector<4x16xi32>
    %4 = arith.cmpi eq, %1, %3 : vector<4x16xi32>
    %5 = arith.extui %4 : vector<4x16xi1> to vector<4x16xi32>
    %6 = arith.sitofp %5 : vector<4x16xi32> to vector<4x16xf32>
    %cst = arith.constant dense<0.000000e+00> : vector<4x8xf32>
    %7 = tpu.matmul %6, %0, %cst {dimension_numbers = #tpu.dot_dimension_numbers<[1], [0], [0], [1], [0, 0, 1, 1], [], []>} : vector<4x16xf32>, vector<16x8xf32>, vector<4x8xf32> -> vector<4x8xf32>
    %c0_3 = arith.constant 0 : index
    %c0_4 = arith.constant 0 : index
    %8 = vector.load %arg2[%c0_3, %c0_4] : memref<9x32xf32, #tpu.memory_space<vmem>>, vector<9x32xf32>
    %9 = vector.extract_strided_slice %8 {offsets = [0, 0], sizes = [8, 32], strides = [1, 1]} : vector<9x32xf32> to vector<8x32xf32>
    %10 = vector.extract_strided_slice %8 {offsets = [8, 0], sizes = [1, 32], strides = [1, 1]} : vector<9x32xf32> to vector<1x32xf32>
    %cst_5 = arith.constant dense<0.000000e+00> : vector<4x32xf32>
    %11 = tpu.matmul %7, %9, %cst_5 {dimension_numbers = #tpu.dot_dimension_numbers<[1], [0], [0], [1], [0, 0, 1, 1], [], []>} : vector<4x8xf32>, vector<8x32xf32>, vector<4x32xf32> -> vector<4x32xf32>
    %12 = vector.broadcast %10 : vector<1x32xf32> to vector<4x32xf32>
    %13 = arith.addf %11, %12 : vector<4x32xf32>
    %cst_6 = arith.constant 0.000000e+00 : f32
    %14 = vector.broadcast %cst_6 : f32 to vector<4x32xf32>
    %15 = arith.maximumf %13, %14 : vector<4x32xf32>
    %c0_7 = arith.constant 0 : index
    %c0_8 = arith.constant 0 : index
    %16 = vector.load %arg3[%c0_7, %c0_8] : memref<33x32xf32, #tpu.memory_space<vmem>>, vector<33x32xf32>
    %17 = vector.extract_strided_slice %16 {offsets = [0, 0], sizes = [32, 32], strides = [1, 1]} : vector<33x32xf32> to vector<32x32xf32>
    %18 = vector.extract_strided_slice %16 {offsets = [32, 0], sizes = [1, 32], strides = [1, 1]} : vector<33x32xf32> to vector<1x32xf32>
    %cst_9 = arith.constant dense<0.000000e+00> : vector<4x32xf32>
    %19 = tpu.matmul %15, %17, %cst_9 {dimension_numbers = #tpu.dot_dimension_numbers<[1], [0], [0], [1], [0, 0, 1, 1], [], []>} : vector<4x32xf32>, vector<32x32xf32>, vector<4x32xf32> -> vector<4x32xf32>
    %20 = vector.broadcast %18 : vector<1x32xf32> to vector<4x32xf32>
    %21 = arith.addf %19, %20 : vector<4x32xf32>
    %cst_10 = arith.constant 0.000000e+00 : f32
    %22 = vector.broadcast %cst_10 : f32 to vector<4x32xf32>
    %23 = arith.maximumf %21, %22 : vector<4x32xf32>
    %c0_11 = arith.constant 0 : index
    %c0_12 = arith.constant 0 : index
    %24 = vector.load %arg4[%c0_11, %c0_12] : memref<33x16xf32, #tpu.memory_space<vmem>>, vector<33x16xf32>
    %25 = vector.extract_strided_slice %24 {offsets = [0, 0], sizes = [32, 16], strides = [1, 1]} : vector<33x16xf32> to vector<32x16xf32>
    %26 = vector.extract_strided_slice %24 {offsets = [32, 0], sizes = [1, 16], strides = [1, 1]} : vector<33x16xf32> to vector<1x16xf32>
    %cst_13 = arith.constant dense<0.000000e+00> : vector<4x16xf32>
    %27 = tpu.matmul %23, %25, %cst_13 {dimension_numbers = #tpu.dot_dimension_numbers<[1], [0], [0], [1], [0, 0, 1, 1], [], []>} : vector<4x32xf32>, vector<32x16xf32>, vector<4x16xf32> -> vector<4x16xf32>
    %28 = vector.broadcast %26 : vector<1x16xf32> to vector<4x16xf32>
    %29 = arith.addf %27, %28 : vector<4x16xf32>
    %c0_14 = arith.constant 0 : index
    %c0_15 = arith.constant 0 : index
    %30 = vector.load %arg5[%c0_14, %c0_15] : memref<4x16xf32, #tpu.memory_space<vmem>>, vector<4x16xf32>
    tpu.vector_store %arg5[%c0_14, %c0_15], %29 {strides = array<i32>} : memref<4x16xf32, #tpu.memory_space<vmem>>, vector<4x16xf32>,
    return
  }
}

</mosaic_0001>

<bundles_post_ra>
// kernel: tpu_custom_call.1
= control target key start
LH: loop header
LB: loop body
LE: loop exit
PB: predicated region body
PF: predicated region fallthrough
CT: control target
= control target key end

     0   :  { %v23_v1 = vlaneseq  ;;  %v453_v2 = vmov 0.0   ;;  %vm454_vm0 = vmmov 0   ;;  %s540_s0 = inlined_call_operand.vmem [shape: s32[1,16], index: 0, kind: input, shape index: {}]   ;;  %s541_s1 = inlined_call_operand.vmem [shape: f32[16,8], index: 1, kind: input, shape index: {}]   ;;  %s542_s2 = inlined_call_operand.vmem [shape: f32[9,32], index: 2, kind: input, shape index: {}]   ;;  %s543_s3 = inlined_call_operand.vmem [shape: f32[33,32], index: 3, kind: input, shape index: {}]   ;;  %s544_s4 = inlined_call_operand.vmem [shape: f32[33,16], index: 4, kind: input, shape index: {}]   ;;  %s545_s5 = inlined_call_operand.hbm [shape: f32[4,16], index: 5, kind: output, shape index: {}]  }
   0x1   :  { %v22_v0 = vld [vmem:[%s541_s1 + $0x8] sm:$0xff]  ;;  %394 = vmatprep.subr.mxu0 %v453_v2  ;;  %v21_v3 = vld [vmem:[%s541_s1] sm:$0xff]  ;;  %398 = vmatprep.mubr.msk.f32.mxu0 %vm454_vm0, %v453_v2 }
   0x2   :  { %v370_v4 = vld [vmem:[%s540_s0] ss:$0 sm:$0xff] }
   0x3   :  { %10 = vsyncpa [#allocation3], 0  ;;  %395 = vmatpush3.msra.mxu0 %v22_v0  ;;  %v24_v5 = vshrl.u32 %v23_v1, 7  ;;  %401 = vmatprep.subr.mxu1 %v453_v2  ;;  %vm33_vm1 = vcmask 130048   ;;  %v107_v7 = vld [vmem:[%s542_s2] sm:$0xff]  ;;  %vm113_vm3 = vcmask 64512  }
   0x4   :  { %396 = vmatprep.subr.mxu0 %v453_v2  ;;  %403 = vmatprep.mubr.msk.f32.mxu1 %vm454_vm0, %v453_v2  ;;  %v191_v8 = vld [vmem:[%s543_s3 + $0x18] sm:$0xff]  ;;  %v190_v11 = vld [vmem:[%s543_s3 + $0x10] sm:$0xff]  ;;  %v189_v12 = vld [vmem:[%s543_s3 + $0x8] sm:$0xff]  ;;  %vm197_vm4 = vcmask 261120   ;;  %s455_s20 = smov [#allocation2]   ;;  %vm354_vm5 = vcmask 125952  }
   0x5   :  { %397 = vmatpush3.msra.mxu0 %v21_v3  ;;  %vm30_vm2 = vcmp.eq.s32.totalorder %v24_v5, %v370_v4  ;;  %402 = vmatpush3.msra.mxu1 %v107_v7  ;;  %v188_v13 = vld [vmem:[%s543_s3] sm:$0xff]  ;;  %v275_v14 = vld [vmem:[%s544_s4 + $0x18] sm:$0xff]  ;;  %v373_v15 = vld [vmem:[%s542_s2 + $0x8] ss:$0 sm:$0xff]  ;;  %s362_s21 = sshll.u32 %s455_s20, 4  ;;  %s363_s21 = int_to_ptr.vmem [resolvable:$true] %s362_s21 }
   0x6   :  { %v371_v6 = vsel %vm30_vm2, 1.0, %v453_v2  ;;  %417 = vmatprep.subr.mxu0 %v453_v2  ;;  %406 = vmatprep.subr.mxu1 %v453_v2  ;;  %v274_v20 = vld [vmem:[%s544_s4 + $0x10] sm:$0xff]  ;;  %v273_v21 = vld [vmem:[%s544_s4 + $0x8] sm:$0xff]  ;;  %v272_v22 = vld [vmem:[%s544_s4] sm:$0xff]  ;;  %s431_s22 = scalar_lea.vmem %s363_s21, 64  ;;  %p436_p1 = scmp.lt.s32.totalorder %s363_s21, %s363_s21 }
   0x7   :  { %399 = vmatmul.mubr.msk.f32.vlgmr.msra.gmra.mxu0 %vm33_vm1, %v371_v6  ;;  %v375_v23 = vld [vmem:[%s543_s3 + $0x20] ss:$0 sm:$0xff]  ;;  %p432_p0 = scmp.ne.s32.totalorder %s363_s21, %s431_s22  ;;  %p437_p2 = scmp.lt.s32.totalorder %s431_s22, %s431_s22 }
   0x8   :  { %425 = vmatprep.mubr.msk.f32.mxu0 %vm454_vm0, %v453_v2  ;;  %418 = vmatpush3.msra.mxu0 %v275_v14  ;;  %v377_v28 = vld [vmem:[%s544_s4 + $0x20] ss:$0 sm:$0xff] }
   0x9   :  { %419 = vmatprep.subr.mxu0 %v453_v2  ;;  %p438_p3 = por %p437_p2, %p436_p1 }
   0xa   :  { %420 = vmatpush3.msra.mxu0 %v274_v20 }
   0xb   :  { %421 = vmatprep.subr.mxu0 %v453_v2  ;;  %p439_p4 = pnand %p438_p3, %p432_p0 }
   0xc   :  { %422 = vmatpush3.msra.mxu0 %v273_v21 }
   0xd   :  { %423 = vmatprep.subr.mxu0 %v453_v2 }
   0xe   :  { %424 = vmatpush3.msra.mxu0 %v272_v22 }
  0xc7   :  { %v103_v9 = vpop.f32.mrf.mxu0 }
  0xc8   :  { %404 = vmatmul.mubr.msk.f32.vlgmr.msra.gmra.mxu1 %vm113_vm3, %v103_v9 }
  0xc9   :  { %v400_v10 = vpop.f32.mrf.mxu0  ;;  %407 = vmatpush3.msra.mxu1 %v191_v8  ;;  %414 = vmatprep.mubr.msk.f32.mxu1 %vm454_vm0, %v453_v2 }
  0xca   :  { %408 = vmatprep.subr.mxu1 %v453_v2 }
  0xcb   :  { %409 = vmatpush3.msra.mxu1 %v190_v11 }
  0xcc   :  { %410 = vmatprep.subr.mxu1 %v453_v2 }
  0xcd   :  { %411 = vmatpush3.msra.mxu1 %v189_v12 }
  0xce   :  { %412 = vmatprep.subr.mxu1 %v453_v2 }
  0xcf   :  { %413 = vmatpush3.msra.mxu1 %v188_v13 }
 0x188   :  { %v183_v16 = vpop.f32.mrf.mxu1 }
 0x189   :  { %v184_v17 = vadd.f32 %v373_v15, %v183_v16 }
 0x18a   :  { %v405_v18 = vpop.f32.mrf.mxu1 }
 0x18b   :  { %v187_v19 = vmax.f32 %v184_v17, 0.0 }
 0x18d   :  { %415 = vmatmul.mubr.msk.f32.vlgmr.msra.gmra.mxu1 %vm197_vm4, %v187_v19 }
 0x24d   :  { %v267_v24 = vpop.f32.mrf.mxu1 }
 0x24e   :  { %v268_v25 = vadd.f32 %v375_v23, %v267_v24 }
 0x24f   :  { %v416_v26 = vpop.f32.mrf.mxu1 }
 0x250   :  { %v271_v27 = vmax.f32 %v268_v25, 0.0 }
 0x252   :  { %426 = vmatmul.mubr.msk.f32.vlgmr.msra.gmra.mxu0 %vm197_vm4, %v271_v27 }
 0x312   :  { %v350_v29 = vpop.f32.mrf.mxu0 }
 0x313   :  { %v351_v30 = vadd.f32 %v377_v28, %v350_v29 }
 0x314   :  { %v427_v31 = vpop.f32.mrf.mxu0 }
 0x315   :  { %355 = vst.msk [vmem:[#allocation2] sm:$0xf] %vm354_vm5, %v351_v30 }
 0x316   :  { %442 = shalt.err (!%p439_p4)
}
 0x317   :  { %365 = dma.vmem_to_hbm [thread:$0]  %s363_s21, 64, %s545_s5, [#allocation3]  }
 0x318   :  { %451 = dma.done.wait [#allocation3], 64  }
 0x319   :  { %452 = vsyncadd [#allocation3], 4294967232 }
 0x31a   :  { %369 = vsyncpa [#allocation3], 1 }

</bundles_post_ra>
